<compile_context>
chip_gen: v7x
topology: tpu7x:2x2x1
jax: 0.10.0
libtpu: 0.0.40
codegen_flags: <defaults>
</compile_context>

<pallas_src>
import jax
import jax.numpy as jnp
from jax import lax
from jax.experimental import pallas as pl
from jax.experimental.pallas import tpu as pltpu


_VMEM_LIMIT = 48 * 1024 * 1024        # safe on v5e/v6e (128 MiB) and v7x (64 MiB)
_IN_BUDGET = 28 * 1024 * 1024         # budget for double-buffered input blocks


def _round_up(a, m):
    return -(-a // m) * m


def _pick_tile(n, candidates, align, max_waste=0.125):
    """Largest candidate tile (multiple of `align`) whose zero-padding waste on
    `n` is <= max_waste; otherwise the candidate minimizing the padded size."""
    chosen = None
    best = None
    for t in candidates:
        if t % align:
            continue
        padded = _round_up(max(n, 1), t)
        waste = (padded - n) / max(n, 1)
        if chosen is None and waste <= max_waste:
            chosen = (t, padded)
        key = (padded, -t)
        if best is None or key < best[0]:
            best = (key, t, padded)
    if chosen is not None:
        return chosen
    if best is not None:
        return best[1], best[2]
    return align, _round_up(max(n, 1), align)


def _pad2d(a, rows, cols):
    r, c = a.shape
    if r == rows and c == cols:
        return a                      # already tile-aligned: skip the HBM copy
    return jnp.pad(a, ((0, rows - r), (0, cols - c)))


# ----------------------------------------------------------------------------
# Branch 1: batch < max(Dx, Dy)  -> sample-space Gram matrices (B x B)
# Grid = (P, nk): P-way split of the feature reduction ("parallel", megacore),
# nk feature tiles per split ("arbitrary").  Partial Grams accumulate in the
# resident output blocks; the final combine is a tiny XLA epilogue.
# ----------------------------------------------------------------------------
def _ka_gram_kernel(x_ref, y_ref, fx_ref, fy_ref):
    k = pl.program_id(1)

    @pl.when(k == 0)
    def _():
        fx_ref[...] = jnp.zeros_like(fx_ref)
        fy_ref[...] = jnp.zeros_like(fy_ref)

    x = x_ref[...]                                    # (Bp, tk), native dtype
    y = y_ref[...]
    dn = (((1,), (1,)), ((), ()))                     # contract the feature axis
    fx_ref[...] += lax.dot_general(x, x, dn, preferred_element_type=jnp.float32)
    fy_ref[...] += lax.dot_general(y, y, dn, preferred_element_type=jnp.float32)


def _ka_gram(x2, y2, dt):
    B = x2.shape[0]
    Dx, Dy = x2.shape[1], y2.shape[1]
    isz = jnp.dtype(dt).itemsize
    sub = 8 if isz >= 4 else (16 if isz == 2 else 32)
    Bp = _round_up(B, sub)

    # Large K tiles (HBM-streaming branch); cap so 2 arrays x 2 pipeline
    # buffers of (Bp, tk) stay within the input VMEM budget.
    tk_cap = max(128, _IN_BUDGET // (4 * Bp * isz))
    cands = [t for t in (2048, 1024, 512, 256, 128) if t <= tk_cap] or [128]
    maxD = max(Dx, Dy)
    tk, Lp = _pick_tile(maxD, cands, 128)
    nk = Lp // tk
    # Split the reduction across two TensorCores (v7x megacore) when possible.
    if nk % 2 == 1 and tk >= 256:
        tk //= 2
        nk *= 2
    if nk % 2 == 0 and nk >= 2:
        P, nk_in = 2, nk // 2
    else:
        P, nk_in = 1, nk

    xp = _pad2d(x2.astype(dt), Bp, Lp)
    yp = _pad2d(y2.astype(dt), Bp, Lp)

    in_spec = pl.BlockSpec((Bp, tk), lambda p, k: (0, p * nk_in + k))
    out_spec = pl.BlockSpec((None, Bp, Bp), lambda p, k: (p, 0, 0))

    flops = 2 * 2 * Bp * Bp * Lp
    bytes_acc = 2 * Bp * Lp * isz + 2 * P * Bp * Bp * 4

    fx_parts, fy_parts = pl.pallas_call(
        _ka_gram_kernel,
        out_shape=(
            jax.ShapeDtypeStruct((P, Bp, Bp), jnp.float32),
            jax.ShapeDtypeStruct((P, Bp, Bp), jnp.float32),
        ),
        grid_spec=pltpu.PrefetchScalarGridSpec(
            num_scalar_prefetch=0,
            grid=(P, nk_in),
            in_specs=[in_spec, in_spec],
            out_specs=[out_spec, out_spec],
        ),
        compiler_params=pltpu.CompilerParams(
            dimension_semantics=("parallel", "arbitrary"),
            vmem_limit_bytes=_VMEM_LIMIT,
        ),
        cost_estimate=pl.CostEstimate(
            flops=int(flops), transcendentals=0, bytes_accessed=int(bytes_acc)),
    )(xp, yp)

    # Tiny (B x B) epilogue in XLA: combine the P partial Grams.
    fx = fx_parts.sum(axis=0)
    fy = fy_parts.sum(axis=0)
    hisc = jnp.sum(fx * fy)
    norm_x = jnp.sqrt(jnp.sum(fx * fx)) + 1e-5
    norm_y = jnp.sqrt(jnp.sum(fy * fy)) + 1e-5
    return -hisc / (norm_x * norm_y) + 1.0


# ----------------------------------------------------------------------------
# Branch 2: batch >= max(Dx, Dy)  -> feature-space Gram matrices (D x D)
# Grid = (ni, ni, nb): the D x D Grams are tiled (td, td) over (i, j)
# ("parallel" -> megacore, VMEM bounded), batch reduction innermost
# ("arbitrary").  Per-tile Frobenius partials are written out; XLA sums them.
# ----------------------------------------------------------------------------
def _ka_feat_kernel(xi_ref, xj_ref, yi_ref, yj_ref,
                    hxy_ref, hxx_ref, hyy_ref,
                    gxy, gxx, gyy):
    b = pl.program_id(2)

    @pl.when(b == 0)
    def _():
        gxy[...] = jnp.zeros_like(gxy)
        gxx[...] = jnp.zeros_like(gxx)
        gyy[...] = jnp.zeros_like(gyy)

    dn = (((0,), (0,)), ((), ()))                     # contract the batch axis
    xi = xi_ref[...]                                  # (tb, td), native dtype
    xj = xj_ref[...]
    yi = yi_ref[...]
    yj = yj_ref[...]
    gxy[...] += lax.dot_general(xi, yj, dn, preferred_element_type=jnp.float32)
    gxx[...] += lax.dot_general(xi, xj, dn, preferred_element_type=jnp.float32)
    gyy[...] += lax.dot_general(yi, yj, dn, preferred_element_type=jnp.float32)

    @pl.when(b == pl.num_programs(2) - 1)
    def _():
        hxy_ref[...] = jnp.full(hxy_ref.shape, jnp.sum(gxy[...] * gxy[...]),
                                jnp.float32)
        hxx_ref[...] = jnp.full(hxx_ref.shape, jnp.sum(gxx[...] * gxx[...]),
                                jnp.float32)
        hyy_ref[...] = jnp.full(hyy_ref.shape, jnp.sum(gyy[...] * gyy[...]),
                                jnp.float32)


def _ka_feat(x2, y2, dt):
    B = x2.shape[0]
    Dx, Dy = x2.shape[1], y2.shape[1]
    isz = jnp.dtype(dt).itemsize
    sub = 8 if isz >= 4 else (16 if isz == 2 else 32)

    maxD = max(Dx, Dy)
    td, Dmp = _pick_tile(maxD, (512, 256, 128), 128)
    tb, Bp = _pick_tile(B, (512, 256, 128, 64, 32, 16, 8), sub)

    # Both inputs share one padded width so a single (i, j) tiling covers all
    # three Grams; the zero columns/rows contribute nothing.
    xp = _pad2d(x2.astype(dt), Bp, Dmp)
    yp = _pad2d(y2.astype(dt), Bp, Dmp)

    ni = Dmp // td
    nb = Bp // tb

    spec_i = pl.BlockSpec((tb, td), lambda i, j, b: (b, i))
    spec_j = pl.BlockSpec((tb, td), lambda i, j, b: (b, j))
    out_spec = pl.BlockSpec((None, None, 8, 128), lambda i, j, b: (i, j, 0, 0))
    out_sds = jax.ShapeDtypeStruct((ni, ni, 8, 128), jnp.float32)

    flops = 3 * 2 * Dmp * Dmp * Bp
    bytes_acc = 4 * ni * ni * nb * tb * td * isz + 3 * ni * ni * 8 * 128 * 4

    hxy, hxx, hyy = pl.pallas_call(
        _ka_feat_kernel,
        out_shape=(out_sds, out_sds, out_sds),
        grid_spec=pltpu.PrefetchScalarGridSpec(
            num_scalar_prefetch=0,
            grid=(ni, ni, nb),
            in_specs=[spec_i, spec_j, spec_i, spec_j],
            out_specs=[out_spec, out_spec, out_spec],
            scratch_shapes=[
                pltpu.VMEM((td, td), jnp.float32),
                pltpu.VMEM((td, td), jnp.float32),
                pltpu.VMEM((td, td), jnp.float32),
            ],
        ),
        compiler_params=pltpu.CompilerParams(
            dimension_semantics=("parallel", "parallel", "arbitrary"),
            vmem_limit_bytes=_VMEM_LIMIT,
        ),
        cost_estimate=pl.CostEstimate(
            flops=int(flops), transcendentals=0, bytes_accessed=int(bytes_acc)),
    )(xp, xp, yp, yp)

    hisc = jnp.sum(hxy[:, :, 0, 0])
    norm_x = jnp.sqrt(jnp.sum(hxx[:, :, 0, 0])) + 1e-5
    norm_y = jnp.sqrt(jnp.sum(hyy[:, :, 0, 0])) + 1e-5
    return -hisc / (norm_x * norm_y) + 1.0


# ----------------------------------------------------------------------------
# Public wrapper: mirrors ka_loss.forward exactly (branch chosen statically
# from the shapes, like the Python `if` in torch).
# ----------------------------------------------------------------------------
def ka_loss(x, y):
    batch_size = x.shape[0]
    x2 = x.reshape(batch_size, -1)
    y2 = y.reshape(batch_size, -1)
    dt = jnp.result_type(x2.dtype, y2.dtype)
    if (not jnp.issubdtype(dt, jnp.floating)) or dt == jnp.float64:
        dt = jnp.float32
    if batch_size < max(x2.shape[1], y2.shape[1]):
        return _ka_gram(x2, y2, dt)
    return _ka_feat(x2, y2, dt)


# Plain-JAX reference (for self-check only).
def ka_loss_ref(x, y):
    b = x.shape[0]
    x2 = x.reshape(b, -1).astype(jnp.float32)
    y2 = y.reshape(b, -1).astype(jnp.float32)
    if b < max(x2.shape[1], y2.shape[1]):
        fx = x2 @ x2.T
        fy = y2 @ y2.T
        hisc = jnp.sum(fx * fy)
        nx = jnp.linalg.norm(fx) + 1e-5
        ny = jnp.linalg.norm(fy) + 1e-5
        return -hisc / (nx * ny) + 1.0
    else:
        hisc = jnp.sum((x2.T @ y2) ** 2)
        nx = jnp.linalg.norm(x2.T @ x2) + 1e-5
        ny = jnp.linalg.norm(y2.T @ y2) + 1e-5
        return -hisc / (nx * ny) + 1.0


if __name__ == "__main__":
    key = jax.random.PRNGKey(0)
    k1, k2, k3, k4 = jax.random.split(key, 4)

    # Case 1: batch < feature-dim  (NCHW activations, like conv features)
    x = jax.random.normal(k1, (2, 4, 16, 16), dtype=jnp.float32)
    y = jax.random.normal(k2, (2, 4, 16, 16), dtype=jnp.float32)
    out1 = ka_loss(x, y)
    jax.block_until_ready(out1)
    ref1 = ka_loss_ref(x, y)

    # Case 2: batch >= feature-dim (exercises the second branch)
    xs = jax.random.normal(k3, (16, 2, 2), dtype=jnp.float32)
    ys = jax.random.normal(k4, (16, 2, 2), dtype=jnp.float32)
    out2 = ka_loss(xs, ys)
    jax.block_until_ready(out2)
    ref2 = ka_loss_ref(xs, ys)

    assert jnp.allclose(out1, ref1, rtol=1e-3, atol=1e-4), (out1, ref1)
    assert jnp.allclose(out2, ref2, rtol=1e-3, atol=1e-4), (out2, ref2)
    print("KERNEL_OK")
</pallas_src>

<mosaic_0001>
module attributes {stable_mosaic.version = 11 : i64} {
  func.func @_ka_gram_kernel(%arg0: i32, %arg1: i32, %arg2: memref<8x512xf32, #tpu.memory_space<vmem>>, %arg3: memref<8x512xf32, #tpu.memory_space<vmem>>, %arg4: memref<1x8x8xf32, #tpu.memory_space<vmem>>, %arg5: memref<1x8x8xf32, #tpu.memory_space<vmem>>) attributes {dimension_semantics = [#tpu.dimension_semantics<parallel>, #tpu.dimension_semantics<arbitrary>], iteration_bounds = array<i64: 2, 1>, scalar_prefetch = 0 : i64, scratch_operands = 0 : i64, tpu.core_type = #tpu.core_type<tc>, window_params = [{transform_indices = @transform_0, window_bounds = array<i64: 8, 512>}, {transform_indices = @transform_1, window_bounds = array<i64: 8, 512>}, {transform_indices = @transform_2, window_bounds = array<i64: 1, 8, 8>}, {transform_indices = @transform_3, window_bounds = array<i64: 1, 8, 8>}]} {
    %c0_i32 = arith.constant 0 : i32
    %0 = arith.cmpi eq, %arg1, %c0_i32 : i32
    %1 = arith.extui %0 : i1 to i32
    %c0_i32_0 = arith.constant 0 : i32
    %2 = arith.cmpi ne, %1, %c0_i32_0 : i32
    scf.if %2 {
      %cst_17 = arith.constant 0.000000e+00 : f32
      %19 = vector.broadcast %cst_17 : f32 to vector<8x8xf32>
      %c0_18 = arith.constant 0 : index
      %c0_19 = arith.constant 0 : index
      %c0_20 = arith.constant 0 : index
      %20 = vector.load %arg4[%c0_18, %c0_19, %c0_20] : memref<1x8x8xf32, #tpu.memory_space<vmem>>, vector<1x8x8xf32>
      %21 = vector.shape_cast %20 : vector<1x8x8xf32> to vector<8x8xf32>
      %22 = vector.shape_cast %19 : vector<8x8xf32> to vector<1x8x8xf32>
      tpu.vector_store %arg4[%c0_18, %c0_19, %c0_20], %22 {strides = array<i32>} : memref<1x8x8xf32, #tpu.memory_space<vmem>>, vector<1x8x8xf32>,
      %cst_21 = arith.constant 0.000000e+00 : f32
      %23 = vector.broadcast %cst_21 : f32 to vector<8x8xf32>
      %c0_22 = arith.constant 0 : index
      %c0_23 = arith.constant 0 : index
      %c0_24 = arith.constant 0 : index
      %24 = vector.load %arg5[%c0_22, %c0_23, %c0_24] : memref<1x8x8xf32, #tpu.memory_space<vmem>>, vector<1x8x8xf32>
      %25 = vector.shape_cast %24 : vector<1x8x8xf32> to vector<8x8xf32>
      %26 = vector.shape_cast %23 : vector<8x8xf32> to vector<1x8x8xf32>
      tpu.vector_store %arg5[%c0_22, %c0_23, %c0_24], %26 {strides = array<i32>} : memref<1x8x8xf32, #tpu.memory_space<vmem>>, vector<1x8x8xf32>,
    } else {
    }
    %c0 = arith.constant 0 : index
    %c0_1 = arith.constant 0 : index
    %3 = vector.load %arg2[%c0, %c0_1] : memref<8x512xf32, #tpu.memory_space<vmem>>, vector<8x512xf32>
    %c0_2 = arith.constant 0 : index
    %c0_3 = arith.constant 0 : index
    %4 = vector.load %arg3[%c0_2, %c0_3] : memref<8x512xf32, #tpu.memory_space<vmem>>, vector<8x512xf32>
    %c0_4 = arith.constant 0 : index
    %c0_5 = arith.constant 0 : index
    %c0_6 = arith.constant 0 : index
    %5 = vector.load %arg4[%c0_4, %c0_5, %c0_6] : memref<1x8x8xf32, #tpu.memory_space<vmem>>, vector<1x8x8xf32>
    %6 = vector.shape_cast %5 : vector<1x8x8xf32> to vector<8x8xf32>
    %cst = arith.constant dense<0.000000e+00> : vector<8x8xf32>
    %7 = tpu.matmul %3, %3, %cst {dimension_numbers = #tpu.dot_dimension_numbers<[1], [1], [0], [0], [0, 0, 1, 0], [], []>} : vector<8x512xf32>, vector<8x512xf32>, vector<8x8xf32> -> vector<8x8xf32>
    %8 = arith.addf %6, %7 : vector<8x8xf32>
    %c0_7 = arith.constant 0 : index
    %c0_8 = arith.constant 0 : index
    %c0_9 = arith.constant 0 : index
    %9 = vector.load %arg4[%c0_7, %c0_8, %c0_9] : memref<1x8x8xf32, #tpu.memory_space<vmem>>, vector<1x8x8xf32>
    %10 = vector.shape_cast %9 : vector<1x8x8xf32> to vector<8x8xf32>
    %11 = vector.shape_cast %8 : vector<8x8xf32> to vector<1x8x8xf32>
    tpu.vector_store %arg4[%c0_7, %c0_8, %c0_9], %11 {strides = array<i32>} : memref<1x8x8xf32, #tpu.memory_space<vmem>>, vector<1x8x8xf32>,
    %c0_10 = arith.constant 0 : index
    %c0_11 = arith.constant 0 : index
    %c0_12 = arith.constant 0 : index
    %12 = vector.load %arg5[%c0_10, %c0_11, %c0_12] : memref<1x8x8xf32, #tpu.memory_space<vmem>>, vector<1x8x8xf32>
    %13 = vector.shape_cast %12 : vector<1x8x8xf32> to vector<8x8xf32>
    %cst_13 = arith.constant dense<0.000000e+00> : vector<8x8xf32>
    %14 = tpu.matmul %4, %4, %cst_13 {dimension_numbers = #tpu.dot_dimension_numbers<[1], [1], [0], [0], [0, 0, 1, 0], [], []>} : vector<8x512xf32>, vector<8x512xf32>, vector<8x8xf32> -> vector<8x8xf32>
    %15 = arith.addf %13, %14 : vector<8x8xf32>
    %c0_14 = arith.constant 0 : index
    %c0_15 = arith.constant 0 : index
    %c0_16 = arith.constant 0 : index
    %16 = vector.load %arg5[%c0_14, %c0_15, %c0_16] : memref<1x8x8xf32, #tpu.memory_space<vmem>>, vector<1x8x8xf32>
    %17 = vector.shape_cast %16 : vector<1x8x8xf32> to vector<8x8xf32>
    %18 = vector.shape_cast %15 : vector<8x8xf32> to vector<1x8x8xf32>
    tpu.vector_store %arg5[%c0_14, %c0_15, %c0_16], %18 {strides = array<i32>} : memref<1x8x8xf32, #tpu.memory_space<vmem>>, vector<1x8x8xf32>,
    return
  }
  func.func @transform_0(%arg0: i32, %arg1: i32) -> (i32, i32) {
    %c1_i32 = arith.constant 1 : i32
    %0 = arith.muli %arg0, %c1_i32 : i32
    %1 = arith.addi %0, %arg1 : i32
    %c0_i32 = arith.constant 0 : i32
    %c0_i32_0 = arith.constant 0 : i32
    return %c0_i32, %1 : i32, i32
  }
  func.func @transform_1(%arg0: i32, %arg1: i32) -> (i32, i32) {
    %c1_i32 = arith.constant 1 : i32
    %0 = arith.muli %arg0, %c1_i32 : i32
    %1 = arith.addi %0, %arg1 : i32
    %c0_i32 = arith.constant 0 : i32
    %c0_i32_0 = arith.constant 0 : i32
    return %c0_i32, %1 : i32, i32
  }
  func.func @transform_2(%arg0: i32, %arg1: i32) -> (i32, i32, i32) {
    %c0_i32 = arith.constant 0 : i32
    %c0_i32_0 = arith.constant 0 : i32
    %c0_i32_1 = arith.constant 0 : i32
    return %arg0, %c0_i32, %c0_i32_0 : i32, i32, i32
  }
  func.func @transform_3(%arg0: i32, %arg1: i32) -> (i32, i32, i32) {
    %c0_i32 = arith.constant 0 : i32
    %c0_i32_0 = arith.constant 0 : i32
    %c0_i32_1 = arith.constant 0 : i32
    return %arg0, %c0_i32, %c0_i32_0 : i32, i32, i32
  }
}

</mosaic_0001>

<bundles_post_ra>
// kernel: tpu_custom_call.1
= control target key start
LH: loop header
LB: loop body
LE: loop exit
PB: predicated region body
PF: predicated region fallthrough
CT: control target
= control target key end

     0   :  { %9 = vsyncpa [#allocation3], 0  ;;  %s1294_s0 = inlined_call_operand.hbm [shape: f32[8,1024], index: 0, kind: input, shape index: {}]   ;;  %s1295_s1 = inlined_call_operand.hbm [shape: f32[8,1024], index: 1, kind: input, shape index: {}]   ;;  %s1296_s2 = inlined_call_operand.hbm [shape: f32[2,8,8], index: 2, kind: output, shape index: {0}]   ;;  %s1297_s3 = inlined_call_operand.hbm [shape: f32[2,8,8], index: 3, kind: output, shape index: {1}]  }
   0x1   :  { %11 = vsyncpa [#allocation3 + $0x1], 0 }
   0x2   :  { %12 = vsyncpa [#allocation6], 0 }
   0x3   :  { %14 = vsyncpa [#allocation6 + $0x1], 0 }
   0x4   :  { %15 = vsyncpa [#allocation4], 0 }
   0x5   :  { %17 = vsyncpa [#allocation4 + $0x1], 0 }
   0x6   :  { %18 = vsyncpa [#allocation9], 0 }
   0x7   :  { %20 = vsyncpa [#allocation9 + $0x1], 0  ;;  %s1028_s12 = smov 0   ;;  %s1030_s13 = smov 0  }
   0x8   :  { %s1032_s14 = smov 0   ;;  %s1034_s15 = smov 0  }
   0x9   :  { %s1036_s16 = smov 0   ;;  %s1038_s17 = smov 0  }
   0xa LB: > { %s727_s18 = sadd.s32 4294967295, %s1001_s17   ;;  %s728_s19 = sadd.s32 4294967294, %s1001_s17   ;;  %s1001_s17 = sphi %s1038_s17, %s26_s17   ;;  %s997_s16 = sphi %s1036_s16, %s1317_s16   ;;  %s993_s15 = sphi %s1034_s15, %s1316_s15   ;;  %s989_s14 = sphi %s1032_s14, %s1315_s14   ;;  %s985_s13 = sphi %s1030_s13, %s1314_s13   ;;  %s981_s12 = sphi %s1028_s12, %s1313_s12  }
   0xb   : > { %s38_s20 = sadd.s32 1, %s997_s16  ;;  %s47_s21 = sadd.s32 1, %s989_s14 }
   0xc   : > { %p40_p0 = scmp.ge.s32.totalorder %s38_s20, 2  ;;  %p54_p1 = scmp.ne.s32.totalorder %s989_s14, %s985_s13 }
   0xd   : > { %p55_p2 = scmp.eq.s32.totalorder %s1001_s17, 0  ;;  %p60_p3 = scmp.ne.s32.totalorder %s985_s13, %s981_s12 }
   0xe   : > { %s1319_s20 = smov (%p40_p0, %s38_s20), 0  ;;  %p61_p5 = scmp.eq.s32.totalorder %s727_s18, 0 }
   0xf   : > { %p1069_p4 = por %p55_p2, %p54_p1  ;;  %s44_s23 = ssub.s32 %s997_s16, %s1319_s20 }
  0x10   : > { %p112_p6 = scmp.eq.s32.totalorder %s727_s18, 1  ;;  %p45_p7 = scmp.eq.s32.totalorder %s44_s23, 0 }
  0x11   : > { %p1075_p8 = por %p61_p5, %p60_p3  ;;  %p118_p10 = scmp.eq.s32.totalorder %s728_s19, 1 }
  0x12   : > { %p1079_p9 = por %p112_p6, %p54_p1  ;;  %p772_p13 = scmp.lt.s32.totalorder %s1001_s17, 2 }
  0x13   : > { %s1301_s24 = scalar_select %p1075_p8, 1, 0 }
  0x14   : > { %s1302_s25 = scalar_select %p1079_p9, 1, 0 }
  0x15   : > { %s1084_s26 = scalar_select %p45_p7, %s989_s14, %s47_s21  }
  0x16   : > { %p1086_p11 = por %p118_p10, %p60_p3  ;;  %s1093_s28 = sand.u32 1, %s989_s14  }
  0x17   : > { %s731_s29 = sshll.u32 %s1093_s28, 5  ;;  %s748_s30 = sshll.u32 %s997_s16, 9 }
  0x18   : > { %s1303_s27 = scalar_select %p1086_p11, 1, 0 }
  0x19   : > { %s1102_s6 = scalar_lea.hbm %s1294_s0, %s748_s30  ;;  %s168_s7 = scalar_lea.vmem [#allocation2], %s731_s29 }
  0x1a   : > { %s177_s8 = sshll.u32 %s168_s7, 4  ;;  %p1110_p0 = pnand %p772_p13, %p1069_p4  ;;  %s1106_s8 = int_to_ptr.vmem [resolvable:$true] %s177_s8 }
  0x1b   : > { %s165_s10 = scalar_lea.sflag [#allocation3], %s1093_s28  ;;  %s823_s11 = scalar_lea.hbm %s1102_s6, 512 }
  0x1c   : > { %p824_p3 = scmp.ne.s32.totalorder %s1102_s6, %s823_s11  ;;  %p825_p5 = pneg %p1110_p0 }
  0x1d   : > { %s828_s21 = scalar_lea.hbm %s1294_s0, 1024  ;;  %p829_p4 = scmp.lt.u32.totalorder %s1102_s6, %s1294_s0 }
  0x1e   : > { %p826_p6 = pnand %p825_p5, %p824_p3  ;;  %p830_p10 = scmp.lt.u32.totalorder %s828_s21, %s823_s11 }
  0x1f   : > { %p832_p12 = scmp.lt.u32.totalorder %s823_s11, %s1102_s6 }
  0x20   : > { %p827_p7 = pneg %p826_p6  ;;  %p831_p13 = por %p830_p10, %p829_p4 }
  0x22   : > { %p833_p1 = por %p832_p12, %p831_p13 }
  0x24   : > { %p834_p2 = pnand %p833_p1, %p827_p7 }
  0x26   : > { %837 = shalt.err (!%p834_p2)
}
  0x27   : > { %s838_s4 = scalar_lea.vmem %s1106_s8, 512  ;;  %s1003_s5 = smov [#allocation2]  }
  0x28   : > { %p839_p3 = scmp.ne.s32.totalorder %s1106_s8, %s838_s4  ;;  %s843_s7 = sshll.u32 %s1003_s5, 4  ;;  %s844_s7 = int_to_ptr.vmem [resolvable:$false] %s843_s7 }
  0x29   : > { %s845_s18 = scalar_lea.vmem %s844_s7, 1024  ;;  %p846_p9 = scmp.lt.s32.totalorder %s1106_s8, %s844_s7 }
  0x2a   : > { %p841_p6 = pnand %p839_p3, %p825_p5  ;;  %p847_p4 = scmp.lt.s32.totalorder %s845_s18, %s838_s4 }
  0x2c   : > { %p842_p11 = pneg %p841_p6  ;;  %p848_p10 = por %p847_p4, %p846_p9 }
  0x2e   : > { %p849_p12 = pnand %p848_p10, %p842_p11 }
  0x30   : > { %852 = shalt.err (!%p849_p12)
}
  0x31   : > { %761 = dma.hbm_to_vmem [thread:$0]  (!%p1110_p0), %s1102_s6, 512, %s1106_s8, %s165_s10  }
  0x32   : > { %p1305_p1 = scmp.lt.s32.totalorder %s1001_s17, 3  ;;  %p1306_p2 = scmp.ge.s32.totalorder %s1001_s17, 1 }
  0x33   : > { %s1155_s22 = scalar_lea.hbm %s1295_s1, %s748_s30  ;;  %s188_s23 = scalar_lea.vmem [#allocation5], %s731_s29 }
  0x34   : > { %p1146_p7 = pnand %p1306_p2, %p1305_p1  ;;  %s197_s4 = sshll.u32 %s188_s23, 4  ;;  %s198_s4 = int_to_ptr.vmem [resolvable:$true] %s197_s4 }
  0x35   : > { %s185_s6 = scalar_lea.sflag [#allocation6], %s1093_s28  ;;  %s853_s8 = scalar_lea.hbm %s1155_s22, 512 }
  0x36   : > { %s1307_s11 = scalar_select %p1146_p7, 1, 0 }
  0x37   : > { %p854_p9 = scmp.ne.s32.totalorder %s1155_s22, %s853_s8  ;;  %s858_s30 = scalar_lea.hbm %s1295_s1, 1024 }
  0x38   : > { %p859_p3 = scmp.lt.u32.totalorder %s1155_s22, %s1295_s1  ;;  %p860_p6 = scmp.lt.u32.totalorder %s858_s30, %s853_s8 }
  0x39   : > { %p856_p11 = pnand %p854_p9, %p825_p5  ;;  %p862_p10 = scmp.lt.u32.totalorder %s853_s8, %s1155_s22 }
  0x3a   : > { %p861_p4 = por %p860_p6, %p859_p3 }
  0x3b   : > { %p857_p13 = pneg %p856_p11 }
  0x3c   : > { %p863_p12 = por %p862_p10, %p861_p4 }
  0x3e   : > { %p864_p1 = pnand %p863_p12, %p857_p13 }
  0x40   : > { %867 = shalt.err (!%p864_p1)
}
  0x41   : > { %s868_s28 = scalar_lea.vmem %s198_s4, 512  ;;  %s1004_s29 = smov [#allocation5]  }
  0x42   : > { %p869_p2 = scmp.ne.s32.totalorder %s198_s4, %s868_s28  ;;  %s873_s19 = sshll.u32 %s1004_s29, 4  ;;  %s874_s19 = int_to_ptr.vmem [resolvable:$false] %s873_s19 }
  0x43   : > { %s875_s21 = scalar_lea.vmem %s874_s19, 1024  ;;  %p876_p8 = scmp.lt.s32.totalorder %s198_s4, %s874_s19 }
  0x44   : > { %p871_p9 = pnand %p869_p2, %p825_p5  ;;  %p877_p7 = scmp.lt.s32.totalorder %s875_s21, %s868_s28 }
  0x46   : > { %p872_p11 = pneg %p871_p9  ;;  %p878_p3 = por %p877_p7, %p876_p8 }
  0x48   : > { %p879_p6 = pnand %p878_p3, %p872_p11 }
  0x4a   : > { %882 = shalt.err (!%p879_p6)
}
  0x4b   : > { %764 = dma.hbm_to_vmem [thread:$0]  (!%p1110_p0), %s1155_s22, 512, %s198_s4, %s185_s6  }
  0x4c   : > { %p1308_p13 = scmp.ne.s32.totalorder %s1307_s11, 0 }
  0x4d   : > { %s1182_s23 = sand.u32 (!%p1308_p13), 1, %s985_s13   ;;  %p1309_p5 = scmp.ne.s32.totalorder (!%p1308_p13), %s1301_s24, 0 }
  0x4e   : > { %206 = sbr.rel (%p1308_p13) target bundleno = 346 (0x15a), region = 28  ;;  %s738_s8 = sshll.u32 (!%p1308_p13), %s1182_s23, 5 }
  0x4f   : > { %s209_s10 = scalar_lea.sflag (!%p1308_p13), [#allocation3], %s1182_s23  ;;  %s212_s5 = scalar_lea.vmem (!%p1308_p13), [#allocation2], %s738_s8 }
  0x55   : > { %964 = dma.done.wait (%p1309_p5), %s209_s10, 512  }
  0x56   : > { %966 = vsyncadd (%p1309_p5), %s209_s10, 4294966784  ;;  %s218_s9 = scalar_lea.sflag [#allocation6], %s1182_s23  ;;  %s221_s22 = scalar_lea.vmem [#allocation5], %s738_s8 }
  0x57   : > { %968 = dma.done.wait (%p1309_p5), %s218_s9, 512  }
  0x58   : > { %970 = vsyncadd (%p1309_p5), %s218_s9, 4294966784  ;;  %v266_v0 = vld [vmem:[%s212_s5 + $0x8] sm:$0xff]  ;;  %v268_v1 = vld [vmem:[%s212_s5 + $0x18] sm:$0xff]  ;;  %s740_s24 = sshll.u32 %s1182_s23, 3  ;;  %vm262_vm0 = vcmask 64512   ;;  %v1005_v8 = vmov 0.0  }
  0x59   : > { %v265_v2 = vld [vmem:[%s212_s5] sm:$0xff]  ;;  %274 = vmatprep.subr.mxu0 %v266_v0  ;;  %344 = vmatprep.subr.mxu1 %v268_v1  ;;  %v267_v3 = vld [vmem:[%s212_s5 + $0x10] sm:$0xff]  ;;  %v270_v4 = vld [vmem:[%s221_s22 + $0x8] sm:$0xff]  ;;  %s246_s11 = scalar_lea.vmem [#allocation7], %s740_s24  ;;  %s1197_s4 = scalar_lea.vmem [#allocation8], %s740_s24 }
  0x5a   : > { %v272_v5 = vld [vmem:[%s221_s22 + $0x18] sm:$0xff]  ;;  %275 = vmatpush1.xpose.msra.mxu0 %v265_v2  ;;  %345 = vmatpush1.xpose.msra.mxu1 %v267_v3  ;;  %v269_v6 = vld [vmem:[%s221_s22] sm:$0xff]  ;;  %v271_v7 = vld [vmem:[%s221_s22 + $0x10] sm:$0xff]  ;;  %263 = vst.msk [vmem:[%s246_s11] sm:$0xff] %vm262_vm0, %v1005_v8  ;;  %s744_s6 = sshll.u32 %s993_s15, 7  ;;  %s579_s30 = sshll.u32 %s246_s11, 4  ;;  %s1209_s30 = int_to_ptr.vmem [resolvable:$true] %s579_s30 }
  0x5b   : > { %338 = vmatprep.mubr.f32.mxu0 %v266_v0  ;;  %408 = vmatprep.mubr.f32.mxu1 %v268_v1  ;;  %264 = vst.msk [vmem:[%s1197_s4] sm:$0xff] %vm262_vm0, %v1005_v8  ;;  %s1207_s28 = scalar_lea.hbm %s1296_s2, %s744_s6  ;;  %s592_s29 = sshll.u32 %s1197_s4, 4  ;;  %s1245_s29 = int_to_ptr.vmem [resolvable:$true] %s592_s29 }
  0x5c   : > { %418 = vmatprep.subr.mxu0 %v270_v4  ;;  %488 = vmatprep.subr.mxu1 %v272_v5  ;;  %s561_s19 = scalar_lea.sflag [#allocation4], %s1182_s23  ;;  %s883_s21 = scalar_lea.vmem %s1209_s30, 128 }
  0x5d   : > { %339 = vmatmul.mubr.f32.vlgmr.msra.gmra.mrb[0].mxu0 %v265_v2  ;;  %409 = vmatmul.mubr.f32.vlgmr.msra.gmra.mrb[0].mxu1 %v267_v3  ;;  %p884_p8 = scmp.ne.s32.totalorder %s1209_s30, %s883_s21  ;;  %p1310_p0 = scmp.ne.s32.totalorder %s1302_s25, 0 }
  0x5e   : > { %419 = vmatpush1.xpose.msra.mxu0 %v269_v6  ;;  %489 = vmatpush1.xpose.msra.mxu1 %v271_v7  ;;  %s1006_s8 = smov [#allocation7]  }
  0x5f   : > { %482 = vmatprep.mubr.f32.mxu0 %v270_v4  ;;  %552 = vmatprep.mubr.f32.mxu1 %v272_v5  ;;  %p885_p7 = pnand %p884_p8, %p1310_p0  ;;  %s887_s10 = sshll.u32 %s1006_s8, 4  ;;  %s888_s10 = int_to_ptr.vmem [resolvable:$false] %s887_s10 }
  0x60   : > { %s889_s5 = scalar_lea.vmem %s888_s10, 256  ;;  %p890_p10 = scmp.lt.s32.totalorder %s1209_s30, %s888_s10 }
  0x61   : > { %483 = vmatmul.mubr.f32.vlgmr.msra.gmra.mrb[2].mxu0 %v269_v6  ;;  %553 = vmatmul.mubr.f32.vlgmr.msra.gmra.mrb[2].mxu1 %v271_v7  ;;  %v273_v10 = vld [vmem:[%s246_s11] sm:$0xff]  ;;  %p886_p4 = pneg %p885_p7  ;;  %p891_p12 = scmp.lt.s32.totalorder %s889_s5, %s883_s21 }
  0x62   : > { %v417_v17 = vld [vmem:[%s1197_s4] sm:$0xff] }
  0x63   : > { %p892_p1 = por %p891_p12, %p890_p10 }
  0x65   : > { %p893_p2 = pnand %p892_p1, %p886_p4 }
 0x130   : > { %v340_v9 = vpop.f32.mrb[0].mxu0  ;;  %v410_v11 = vpop.f32.mrb[0].mxu1 }
 0x131   : > { %v411_v12 = vadd.f32 %v410_v11, %v340_v9  ;;  %v342_v13 = vpop.f32.mrb[1].mxu0  ;;  %v412_v14 = vpop.f32.mrb[1].mxu1 }
 0x133   : > { %v414_v15 = vadd.f32 %v411_v12, %v273_v10 }
 0x134   : > { %v484_v16 = vpop.f32.mrb[2].mxu0  ;;  %v554_v18 = vpop.f32.mrb[2].mxu1 }
 0x135   : > { %416 = vst.msk [vmem:[%s246_s11] sm:$0xff] %vm262_vm0, %v414_v15  ;;  %v555_v19 = vadd.f32 %v554_v18, %v484_v16  ;;  %v486_v20 = vpop.f32.mrb[3].mxu0  ;;  %v556_v21 = vpop.f32.mrb[3].mxu1 }
 0x136   : > { %896 = shalt.err (!%p893_p2)
}
 0x137   : > { %s897_s9 = scalar_lea.hbm %s1207_s28, 128  ;;  %s901_s11 = scalar_lea.hbm %s1296_s2, 256 }
 0x138   : > { %p898_p9 = scmp.ne.s32.totalorder %s1207_s28, %s897_s9  ;;  %p902_p6 = scmp.lt.u32.totalorder %s1207_s28, %s1296_s2 }
 0x139   : > { %p903_p13 = scmp.lt.u32.totalorder %s901_s11, %s897_s9  ;;  %p905_p8 = scmp.lt.u32.totalorder %s897_s9, %s1207_s28 }
 0x13a   : > { %p899_p11 = pnand %p898_p9, %p1310_p0 }
 0x13b   : > { %p904_p5 = por %p903_p13, %p902_p6 }
 0x13c   : > { %p900_p3 = pneg %p899_p11 }
 0x13d   : > { %p906_p7 = por %p905_p8, %p904_p5 }
 0x13f   : > { %p907_p4 = pnand %p906_p7, %p900_p3 }
 0x141   : > { %910 = shalt.err (!%p907_p4)
}
 0x142   : > { %754 = dma.vmem_to_hbm [thread:$0]  (%p1310_p0), %s1209_s30, 128, %s1207_s28, %s561_s19   ;;  %v558_v22 = vadd.f32 %v555_v19, %v417_v17 }
 0x143   : > { %s1241_s10 = scalar_lea.hbm %s1297_s3, %s744_s6  ;;  %s566_s5 = scalar_lea.sflag [#allocation9], %s1182_s23 }
 0x144   : > { %559 = vst.msk [vmem:[%s1197_s4] sm:$0xff] %vm262_vm0, %v558_v22  ;;  %s911_s9 = scalar_lea.vmem %s1245_s29, 128  ;;  %s1007_s15 = smov [#allocation8]  }
 0x145   : > { %p912_p10 = scmp.ne.s32.totalorder %s1245_s29, %s911_s9  ;;  %s915_s30 = sshll.u32 %s1007_s15, 4  ;;  %s916_s30 = int_to_ptr.vmem [resolvable:$false] %s915_s30 }
 0x146   : > { %s917_s28 = scalar_lea.vmem %s916_s30, 256  ;;  %p918_p2 = scmp.lt.s32.totalorder %s1245_s29, %s916_s30 }
 0x147   : > { %p913_p12 = pnand %p912_p10, %p1310_p0  ;;  %p919_p9 = scmp.lt.s32.totalorder %s917_s28, %s911_s9 }
 0x149   : > { %p914_p1 = pneg %p913_p12  ;;  %p920_p11 = por %p919_p9, %p918_p2 }
 0x14b   : > { %p921_p3 = pnand %p920_p11, %p914_p1 }
 0x14d   : > { %924 = shalt.err (!%p921_p3)
}
 0x14e   : > { %s925_s23 = scalar_lea.hbm %s1241_s10, 128  ;;  %s929_s19 = scalar_lea.hbm %s1297_s3, 256 }
 0x14f   : > { %p926_p6 = scmp.ne.s32.totalorder %s1241_s10, %s925_s23  ;;  %p930_p8 = scmp.lt.u32.totalorder %s1241_s10, %s1297_s3 }
 0x150   : > { %p931_p7 = scmp.lt.u32.totalorder %s929_s19, %s925_s23  ;;  %p933_p10 = scmp.lt.u32.totalorder %s925_s23, %s1241_s10 }
 0x151   : > { %p927_p13 = pnand %p926_p6, %p1310_p0 }
 0x152   : > { %p932_p4 = por %p931_p7, %p930_p8 }
 0x153   : > { %p928_p5 = pneg %p927_p13 }
 0x154   : > { %p934_p12 = por %p933_p10, %p932_p4 }
 0x156   : > { %p935_p1 = pnand %p934_p12, %p928_p5 }
 0x158   : > { %938 = shalt.err (!%p935_p1)
}
 0x159   : > { %755 = dma.vmem_to_hbm [thread:$0]  (%p1310_p0), %s1245_s29, 128, %s1241_s10, %s566_s5  }
 0x15a PF: > { %s604_s11 = sand.u32 1, %s981_s12   ;;  %p1311_p2 = scmp.ne.s32.totalorder %s1303_s27, 0 }
 0x15b   : > { %p1312_p9 = scmp.ge.s32.totalorder %s1001_s17, 2  ;;  %s605_s7 = scalar_lea.sflag [#allocation4], %s604_s11 }
 0x15d   : > { %p766_p11 = pnand %p1312_p9, %p1311_p2 }
 0x15f   : > { %972 = dma.done.wait (!%p766_p11), %s605_s7, 128  }
 0x160   : > { %974 = vsyncadd (!%p766_p11), %s605_s7, 4294967168  ;;  %s614_s18 = scalar_lea.sflag [#allocation9], %s604_s11 }
 0x161   : > { %976 = dma.done.wait (!%p766_p11), %s614_s18, 128  }
 0x162   : > { %978 = vsyncadd (!%p766_p11), %s614_s18, 4294967168  ;;  %s26_s17 = sadd.s32 1, %s1001_s17   ;;  %s1313_s12 = smov %s985_s13 }
 0x163   : > { %p23_p3 = scmp.ge.s32.totalorder %s26_s17, 4   ;;  %s1314_s13 = smov %s989_s14 }
 0x164   : > { %s1315_s14 = smov %s1084_s26  ;;  %s1316_s15 = smov %s997_s16 }
 0x165   : > { %s1317_s16 = smov %s1319_s20  ;;  %25 = sbr.rel (!%p23_p3) target bundleno = 10 (0xa), region = 107 }
 0x16c   :  { %619 = vsyncpa [#allocation3], 1 }
 0x16d   :  { %621 = vsyncpa [#allocation3 + $0x1], 1 }
 0x16e   :  { %622 = vsyncpa [#allocation6], 1 }
 0x16f   :  { %624 = vsyncpa [#allocation6 + $0x1], 1 }
 0x170   :  { %625 = vsyncpa [#allocation4], 1 }
 0x171   :  { %627 = vsyncpa [#allocation4 + $0x1], 1 }
 0x172   :  { %628 = vsyncpa [#allocation9], 1 }
 0x173   :  { %630 = vsyncpa [#allocation9 + $0x1], 1 }

</bundles_post_ra>
